<compile_context>
chip_gen: v6e
topology: v6e:2x2x1
jax: 0.10.0
libtpu: 0.0.40
codegen_flags: <defaults>
</compile_context>

<pallas_src>
import functools
import math

import jax
import jax.numpy as jnp
from jax import lax
from jax.experimental import pallas as pl
from jax.experimental.pallas import tpu as pltpu


# ----------------------------- in-kernel helpers -----------------------------

def _layernorm(x, g, b, eps):
    # x: (R, D) f32, g/b: (1, D) f32.  Unbiased std (D-1), eps added to std.
    mean = jnp.mean(x, axis=-1, keepdims=True)
    xc = x - mean
    d = x.shape[-1]
    var_unbiased = jnp.sum(xc * xc, axis=-1, keepdims=True) * (1.0 / (d - 1))
    inv = pl.reciprocal(jnp.sqrt(var_unbiased) + eps, approx=True)   # EUP slot
    return g * (xc * inv) + b


# ------------------------------- Pallas kernels -------------------------------

def kv_proj_kernel(x_ref, wk_ref, bk_ref, wv_ref, bv_ref, k_ref, v_ref, *, h):
    """Per batch element: K^T (h, dk, S) and V (h, S, dk) caches in bf16."""
    x = x_ref[0].astype(jnp.bfloat16)                                 # (S, D)
    S, D = x.shape
    dk = D // h

    k = jnp.dot(x, wk_ref[...], preferred_element_type=jnp.float32) + bk_ref[0]
    v = jnp.dot(x, wv_ref[...], preferred_element_type=jnp.float32) + bv_ref[0]

    k3 = k.reshape(S, h, dk)
    # K stored transposed (h, dk, S): lane dim is S (lane-dense for S >= 128)
    # and the QK^T einsum in the layer kernel needs no runtime RHS transpose.
    for i in range(h):                                                # static loop
        k_ref[0, i] = k3[:, i, :].T.astype(jnp.bfloat16)              # (dk, S)
    v_ref[0] = jnp.swapaxes(v.reshape(S, h, dk), 0, 1).astype(jnp.bfloat16)


def encoder_layer_kernel(x_q_ref, bias_ref, k_ref, v_ref,
                         wq_ref, bq_ref, wo_ref, bo_ref,
                         g1_ref, be1_ref, w1_ref, bf1_ref, w2_ref, bf2_ref,
                         g2_ref, be2_ref, gf_ref, bff_ref,
                         o_ref, q_scratch,
                         *, h, hch, eps, fuse_final_ln):
    # grid = (B, num_q_tiles); both axes independent ("parallel").
    x_q = x_q_ref[0].astype(jnp.float32)                              # (tq, D)
    tq, D = x_q.shape
    dk = D // h

    # ---- Q projection (1/sqrt(dk) already folded into wq/bq host-side) ----
    q = jnp.dot(x_q.astype(jnp.bfloat16), wq_ref[...],
                preferred_element_type=jnp.float32) + bq_ref[0]       # (tq, D) f32
    q_scratch[...] = jnp.swapaxes(q.reshape(tq, h, dk), 0, 1).astype(jnp.bfloat16)

    bias = bias_ref[0]                                                # (1, S) or (tq, S)
    n_chunks = h // hch

    # ---- head-chunked attention: bounds live f32 working set to (hch, tq, S) ----
    def head_chunk(c, attn):
        hc0 = pl.multiple_of(c * hch, hch)
        q_c = q_scratch[pl.ds(hc0, hch)]                              # (hch, tq, dk) bf16
        k_c = k_ref[0, pl.ds(hc0, hch)]                               # (hch, dk, S)  bf16
        v_c = v_ref[0, pl.ds(hc0, hch)]                               # (hch, S, dk)  bf16
        wo_c = wo_ref[pl.ds(hc0, hch)]                                # (hch, dk, D)  bf16

        s = jnp.einsum('cqd,cds->cqs', q_c, k_c,
                       preferred_element_type=jnp.float32)            # (hch, tq, S) f32
        s = s + bias[None]                                            # additive mask bias
        m = jnp.max(s, axis=-1, keepdims=True)
        e = jnp.exp(s - m)
        p = e * pl.reciprocal(jnp.sum(e, axis=-1, keepdims=True), approx=True)

        ctx = jnp.einsum('cqs,csd->cqd', p.astype(jnp.bfloat16), v_c,
                         preferred_element_type=jnp.float32)          # (hch, tq, dk) f32
        # Output projection folded per head: no (h,tq,dk)->(tq,D) relayout.
        for i in range(hch):                                          # static loop
            attn = attn + jnp.dot(ctx[i].astype(jnp.bfloat16), wo_c[i],
                                  preferred_element_type=jnp.float32)
        return attn

    attn = lax.fori_loop(0, n_chunks, head_chunk,
                         jnp.zeros((tq, D), jnp.float32), unroll=True)
    attn = attn + bo_ref[0]

    # ---- residual + LayerNorm 1 (dropout = identity in eval) ----
    y = _layernorm(x_q + attn, g1_ref[...], be1_ref[...], eps)

    # ---- position-wise feed forward (bf16 MXU operands, f32 accumulation) ----
    hdn = jnp.maximum(
        jnp.dot(y.astype(jnp.bfloat16), w1_ref[...],
                preferred_element_type=jnp.float32) + bf1_ref[0], 0.0)
    ff = jnp.dot(hdn.astype(jnp.bfloat16), w2_ref[...],
                 preferred_element_type=jnp.float32) + bf2_ref[0]

    # ---- residual + LayerNorm 2 ----
    z = _layernorm(y + ff, g2_ref[...], be2_ref[...], eps)

    # ---- fused final encoder LayerNorm (last layer only; static flag) ----
    if fuse_final_ln:
        z = _layernorm(z, gf_ref[...], bff_ref[...], eps)

    o_ref[0] = z.astype(o_ref.dtype)


def final_norm_kernel(x_ref, g_ref, b_ref, o_ref, *, eps):
    # Fallback only (used when the encoder has zero layers).
    x = x_ref[0].astype(jnp.float32)
    o_ref[0] = _layernorm(x, g_ref[...], b_ref[...], eps).astype(o_ref.dtype)


# ------------------------------- host wrappers --------------------------------

def _vmem_limit_bytes():
    """Generation-aware VMEM budget: leave headroom for compiler scratch."""
    try:
        cap = int(pltpu.get_tpu_info().vmem_capacity_bytes)
    except Exception:
        return 48 * 1024 * 1024              # conservative: fits every generation
    return int(min(cap - 16 * 1024 * 1024, 112 * 1024 * 1024))


def _choose_tq(S, vmem_limit):
    """Query-tile size: bigger tiles on 128 MiB parts (v5e/v6e), smaller on v7x."""
    max_tq = 512 if vmem_limit >= 96 * 1024 * 1024 else 256
    if S <= max_tq:
        return S
    for cand in (512, 256, 128, 64, 32, 16, 8):
        if cand <= max_tq and S % cand == 0:
            return cand
    return S


def _choose_head_chunk(h, tq, S, budget_bytes=6 * 1024 * 1024):
    """Heads per attention chunk so the live f32 softmax set stays bounded."""
    per_head = 3 * tq * S * 4                # scores / exp / probs in f32
    hch = max(1, min(h, budget_bytes // max(per_head, 1)))
    while h % hch:
        hch -= 1
    return int(hch)


def _cost_estimate(B, S, D, d_ff, h):
    flops = (4 * B * S * D * D            # Q and O projections
             + 4 * B * S * S * D          # QK^T and PV
             + 4 * B * S * D * d_ff)      # FFN
    transcendentals = B * h * S * S + 4 * B * S
    bytes_accessed = (2 * B * S * D * 4                        # x in + out (f32)
                      + 2 * B * S * D * 2                      # K^T / V caches (bf16)
                      + B * S * 4                              # mask bias (approx)
                      + (2 * D * D + 2 * D * d_ff) * 2         # bf16 weights
                      + 12 * D * 4)                            # biases + LN params
    return pl.CostEstimate(flops=flops, transcendentals=transcendentals,
                           bytes_accessed=bytes_accessed)


def make_attn_bias(mask):
    """mask: (B, S) / (B, 1, S) / (B, S, S), 1.0 = attend, 0.0 = masked.
    Returns additive bias (B, 1, S) or (B, S, S): 0.0 where attended, -1e9 where masked."""
    mask = jnp.asarray(mask)
    if mask.ndim == 2:
        mask = mask[:, None, :]
    return jnp.where(mask > 0, 0.0, -1e9).astype(jnp.float32)


def kv_projection(x, p, *, h, vmem_limit):
    B, S, D = x.shape
    dk = D // h

    def wspec(shape):
        return pl.BlockSpec(shape, lambda b: (0,) * len(shape),
                            pipeline_mode=pl.Buffered(1))

    return pl.pallas_call(
        functools.partial(kv_proj_kernel, h=h),
        out_shape=(jax.ShapeDtypeStruct((B, h, dk, S), jnp.bfloat16),
                   jax.ShapeDtypeStruct((B, h, S, dk), jnp.bfloat16)),
        grid=(B,),
        in_specs=[pl.BlockSpec((1, S, D), lambda b: (b, 0, 0)),
                  wspec((D, D)), wspec((1, D)),            # wk, bk
                  wspec((D, D)), wspec((1, D))],           # wv, bv
        out_specs=(pl.BlockSpec((1, h, dk, S), lambda b: (b, 0, 0, 0)),
                   pl.BlockSpec((1, h, S, dk), lambda b: (b, 0, 0, 0))),
        compiler_params=pltpu.CompilerParams(
            dimension_semantics=("parallel",),
            vmem_limit_bytes=vmem_limit),
    )(x, p["wk"], p["bk"], p["wv"], p["bv"])


def encoder_layer(x, attn_bias, p, *, h, eps=1e-6, final_ln=None, vmem_limit=None):
    B, S, D = x.shape
    dk = D // h
    d_ff = p["w1"].shape[1]
    if vmem_limit is None:
        vmem_limit = _vmem_limit_bytes()
    tq = _choose_tq(S, vmem_limit)
    nq = S // tq
    hch = _choose_head_chunk(h, tq, S)
    mq = attn_bias.shape[1]          # 1 (key-padding) or S (full mask)

    if final_ln is None:
        fuse = False
        gf = jnp.ones((1, D), jnp.float32)
        bff = jnp.zeros((1, D), jnp.float32)
    else:
        fuse = True
        gf, bff = final_ln

    # K/V caches computed once per layer (own kernel) -> layer grid is fully parallel.
    k_t, v_h = kv_projection(x, p, h=h, vmem_limit=vmem_limit)

    def const(shape):
        # Grid-invariant operand: constant index_map never re-DMAs, so single-buffer.
        return pl.BlockSpec(shape, lambda b, q: (0,) * len(shape),
                            pipeline_mode=pl.Buffered(1))

    if mq == 1:
        bias_spec = pl.BlockSpec((1, 1, S), lambda b, q: (b, 0, 0))
    else:
        bias_spec = pl.BlockSpec((1, tq, S), lambda b, q: (b, q, 0))

    grid_spec = pltpu.PrefetchScalarGridSpec(
        num_scalar_prefetch=0,
        grid=(B, nq),
        in_specs=[
            pl.BlockSpec((1, tq, D), lambda b, q: (b, q, 0)),          # x query rows
            bias_spec,                                                 # additive mask bias
            pl.BlockSpec((1, h, dk, S), lambda b, q: (b, 0, 0, 0)),    # K^T cache (bf16)
            pl.BlockSpec((1, h, S, dk), lambda b, q: (b, 0, 0, 0)),    # V cache (bf16)
            const((D, D)), const((1, D)),                              # wq (pre-scaled), bq
            const((h, dk, D)), const((1, D)),                          # wo (head-major), bo
            const((1, D)), const((1, D)),                              # ln1 gamma, beta
            const((D, d_ff)), const((1, d_ff)),                        # w1, b1
            const((d_ff, D)), const((1, D)),                           # w2, b2
            const((1, D)), const((1, D)),                              # ln2 gamma, beta
            const((1, D)), const((1, D)),                              # final LN gamma, beta
        ],
        out_specs=pl.BlockSpec((1, tq, D), lambda b, q: (b, q, 0)),
        scratch_shapes=[pltpu.VMEM((h, tq, dk), jnp.bfloat16)],        # head-major Q staging
    )

    return pl.pallas_call(
        functools.partial(encoder_layer_kernel, h=h, hch=hch, eps=eps,
                          fuse_final_ln=fuse),
        out_shape=jax.ShapeDtypeStruct((B, S, D), x.dtype),
        grid_spec=grid_spec,
        compiler_params=pltpu.CompilerParams(
            dimension_semantics=("parallel", "parallel"),
            vmem_limit_bytes=vmem_limit),
        cost_estimate=_cost_estimate(B, S, D, d_ff, h),
    )(x, attn_bias, k_t, v_h,
      p["wq"], p["bq"], p["wo"], p["bo"],
      p["g1"], p["be1"], p["w1"], p["bf1"], p["w2"], p["bf2"], p["g2"], p["be2"],
      gf, bff)


def final_layernorm(x, g, b, *, eps=1e-6):
    # Only used when the encoder has zero layers (otherwise fused into last layer).
    B, S, D = x.shape
    return pl.pallas_call(
        functools.partial(final_norm_kernel, eps=eps),
        out_shape=jax.ShapeDtypeStruct((B, S, D), x.dtype),
        grid=(B,),
        in_specs=[
            pl.BlockSpec((1, S, D), lambda b: (b, 0, 0)),
            pl.BlockSpec((1, D), lambda b: (0, 0)),
            pl.BlockSpec((1, D), lambda b: (0, 0)),
        ],
        out_specs=pl.BlockSpec((1, S, D), lambda b: (b, 0, 0)),
        compiler_params=pltpu.CompilerParams(dimension_semantics=("parallel",)),
    )(x, g, b)


def encoder_forward(x, mask, params, *, h):
    attn_bias = make_attn_bias(mask)            # computed once, shared by all layers
    vmem_limit = _vmem_limit_bytes()
    layers = params["layers"]
    if not layers:
        return final_layernorm(x, params["norm_g"], params["norm_b"])
    for i, p in enumerate(layers):
        is_last = i == len(layers) - 1
        fin = (params["norm_g"], params["norm_b"]) if is_last else None
        x = encoder_layer(x, attn_bias, p, h=h, final_ln=fin, vmem_limit=vmem_limit)
    return x


# ------------------------------ parameter init --------------------------------

def init_params(key, n_layers, d_model, d_ff, h):
    """Params already in kernel layout:
       - wq, bq pre-scaled by 1/sqrt(dk) (one-time host transform, removes the
         per-step q *= 1/sqrt(dk) pass);
       - wo stored head-major (h, dk, d_model);
       - matmul weights bf16 (MXU operands), biases / LN params f32."""
    dk = d_model // h
    inv_sqrt_dk = 1.0 / math.sqrt(dk)
    layers = []
    for _ in range(n_layers):
        keys = jax.random.split(key, 7)
        key = keys[0]

        def w(k, shape):
            return 0.02 * jax.random.normal(k, shape, jnp.float32)

        p = {
            "wq": (w(keys[1], (d_model, d_model)) * inv_sqrt_dk).astype(jnp.bfloat16),
            "bq": (jnp.zeros((d_model,), jnp.float32) * inv_sqrt_dk).reshape(1, d_model),
            "wk": w(keys[2], (d_model, d_model)).astype(jnp.bfloat16),
            "bk": jnp.zeros((1, d_model), jnp.float32),
            "wv": w(keys[3], (d_model, d_model)).astype(jnp.bfloat16),
            "bv": jnp.zeros((1, d_model), jnp.float32),
            "wo": w(keys[4], (d_model, d_model)).reshape(h, dk, d_model).astype(jnp.bfloat16),
            "bo": jnp.zeros((1, d_model), jnp.float32),
            "g1": jnp.ones((1, d_model), jnp.float32),
            "be1": jnp.zeros((1, d_model), jnp.float32),
            "w1": w(keys[5], (d_model, d_ff)).astype(jnp.bfloat16),
            "bf1": jnp.zeros((1, d_ff), jnp.float32),
            "w2": w(keys[6], (d_ff, d_model)).astype(jnp.bfloat16),
            "bf2": jnp.zeros((1, d_model), jnp.float32),
            "g2": jnp.ones((1, d_model), jnp.float32),
            "be2": jnp.zeros((1, d_model), jnp.float32),
        }
        layers.append(p)
    return {
        "layers": layers,
        "norm_g": jnp.ones((1, d_model), jnp.float32),
        "norm_b": jnp.zeros((1, d_model), jnp.float32),
    }


# ------------------------------------ main -------------------------------------

if __name__ == "__main__":
    # Small demo shapes consistent with Encoder(n_layers, d_model, d_ff, h).
    # NOTE: for real deployments keep d_model / d_ff / S multiples of 128 so
    # matmuls and stores are lane-dense; the tiny demo config leaves lanes masked.
    n_layers, d_model, d_ff, h = 2, 32, 64, 4
    B, S = 2, 8

    key = jax.random.PRNGKey(0)
    kx, kp = jax.random.split(key)

    x = jax.random.normal(kx, (B, S, d_model), jnp.float32)

    # Key-padding mask: batch 0 attends to all 8 positions, batch 1 to the first 6.
    lengths = jnp.array([S, 6], jnp.int32)
    key_valid = (jnp.arange(S)[None, :] < lengths[:, None]).astype(jnp.float32)  # (B, S)
    mask = key_valid[:, None, :]                                                 # (B, 1, S)

    params = init_params(kp, n_layers, d_model, d_ff, h)

    out = encoder_forward(x, mask, params, h=h)
    out = jax.block_until_ready(out)
    assert out.shape == (B, S, d_model)
    assert bool(jnp.all(jnp.isfinite(out)))
    print("KERNEL_OK")
</pallas_src>

<mosaic_0001>
module attributes {stable_mosaic.version = 11 : i64} {
  func.func @kv_proj_kernel(%arg0: i32, %arg1: memref<1x8x32xf32, #tpu.memory_space<vmem>>, %arg2: memref<32x32xbf16, #tpu.memory_space<vmem>>, %arg3: memref<1x32xf32, #tpu.memory_space<vmem>>, %arg4: memref<32x32xbf16, #tpu.memory_space<vmem>>, %arg5: memref<1x32xf32, #tpu.memory_space<vmem>>, %arg6: memref<1x4x8x8xbf16, #tpu.memory_space<vmem>>, %arg7: memref<1x4x8x8xbf16, #tpu.memory_space<vmem>>) attributes {dimension_semantics = [#tpu.dimension_semantics<parallel>], iteration_bounds = array<i64: 2>, scalar_prefetch = 0 : i64, scratch_operands = 0 : i64, tpu.core_type = #tpu.core_type<tc>, window_params = [{transform_indices = @transform_0, window_bounds = array<i64: 1, 8, 32>}, {pipeline_mode = #tpu.pipeline_mode<synchronous>, transform_indices = @transform_1, window_bounds = array<i64: 32, 32>}, {pipeline_mode = #tpu.pipeline_mode<synchronous>, transform_indices = @transform_2, window_bounds = array<i64: 1, 32>}, {pipeline_mode = #tpu.pipeline_mode<synchronous>, transform_indices = @transform_3, window_bounds = array<i64: 32, 32>}, {pipeline_mode = #tpu.pipeline_mode<synchronous>, transform_indices = @transform_4, window_bounds = array<i64: 1, 32>}, {transform_indices = @transform_5, window_bounds = array<i64: 1, 4, 8, 8>}, {transform_indices = @transform_6, window_bounds = array<i64: 1, 4, 8, 8>}]} {
    %c0 = arith.constant 0 : index
    %c0_0 = arith.constant 0 : index
    %c0_1 = arith.constant 0 : index
    %0 = vector.load %arg1[%c0, %c0_0, %c0_1] : memref<1x8x32xf32, #tpu.memory_space<vmem>>, vector<1x8x32xf32>
    %1 = vector.shape_cast %0 : vector<1x8x32xf32> to vector<8x32xf32>
    %2 = arith.truncf %1 : vector<8x32xf32> to vector<8x32xbf16>
    %c0_2 = arith.constant 0 : index
    %c0_3 = arith.constant 0 : index
    %3 = vector.load %arg2[%c0_2, %c0_3] : memref<32x32xbf16, #tpu.memory_space<vmem>>, vector<32x32xbf16>
    %cst = arith.constant dense<0.000000e+00> : vector<8x32xf32>
    %4 = tpu.matmul %2, %3, %cst {dimension_numbers = #tpu.dot_dimension_numbers<[1], [0], [0], [1], [0, 0, 1, 1], [], []>} : vector<8x32xbf16>, vector<32x32xbf16>, vector<8x32xf32> -> vector<8x32xf32>
    %c0_4 = arith.constant 0 : index
    %c0_5 = arith.constant 0 : index
    %5 = vector.load %arg3[%c0_4, %c0_5] : memref<1x32xf32, #tpu.memory_space<vmem>>, vector<1x32xf32>
    %6 = vector.shape_cast %5 : vector<1x32xf32> to vector<32xf32>
    %7 = vector.shape_cast %6 : vector<32xf32> to vector<1x32xf32>
    %8 = vector.broadcast %7 : vector<1x32xf32> to vector<8x32xf32>
    %9 = arith.addf %4, %8 : vector<8x32xf32>
    %c0_6 = arith.constant 0 : index
    %c0_7 = arith.constant 0 : index
    %10 = vector.load %arg4[%c0_6, %c0_7] : memref<32x32xbf16, #tpu.memory_space<vmem>>, vector<32x32xbf16>
    %cst_8 = arith.constant dense<0.000000e+00> : vector<8x32xf32>
    %11 = tpu.matmul %2, %10, %cst_8 {dimension_numbers = #tpu.dot_dimension_numbers<[1], [0], [0], [1], [0, 0, 1, 1], [], []>} : vector<8x32xbf16>, vector<32x32xbf16>, vector<8x32xf32> -> vector<8x32xf32>
    %c0_9 = arith.constant 0 : index
    %c0_10 = arith.constant 0 : index
    %12 = vector.load %arg5[%c0_9, %c0_10] : memref<1x32xf32, #tpu.memory_space<vmem>>, vector<1x32xf32>
    %13 = vector.shape_cast %12 : vector<1x32xf32> to vector<32xf32>
    %14 = vector.shape_cast %13 : vector<32xf32> to vector<1x32xf32>
    %15 = vector.broadcast %14 : vector<1x32xf32> to vector<8x32xf32>
    %16 = arith.addf %11, %15 : vector<8x32xf32>
    %17 = vector.shape_cast %9 : vector<8x32xf32> to vector<8x4x8xf32>
    %18 = vector.extract_strided_slice %17 {offsets = [0, 0, 0], sizes = [8, 1, 8], strides = [1, 1, 1]} : vector<8x4x8xf32> to vector<8x1x8xf32>
    %19 = vector.shape_cast %18 : vector<8x1x8xf32> to vector<8x8xf32>
    %20 = tpu.transpose %19, [1, 0] : vector<8x8xf32> -> vector<8x8xf32>
    %21 = arith.truncf %20 : vector<8x8xf32> to vector<8x8xbf16>
    %c0_11 = arith.constant 0 : index
    %c0_12 = arith.constant 0 : index
    %c0_13 = arith.constant 0 : index
    %c0_14 = arith.constant 0 : index
    %22 = vector.load %arg6[%c0_11, %c0_12, %c0_13, %c0_14] : memref<1x4x8x8xbf16, #tpu.memory_space<vmem>>, vector<1x1x8x8xbf16>
    %23 = vector.shape_cast %22 : vector<1x1x8x8xbf16> to vector<8x8xbf16>
    %24 = vector.shape_cast %21 : vector<8x8xbf16> to vector<1x1x8x8xbf16>
    tpu.vector_store %arg6[%c0_11, %c0_12, %c0_13, %c0_14], %24 {strides = array<i32>} : memref<1x4x8x8xbf16, #tpu.memory_space<vmem>>, vector<1x1x8x8xbf16>,
    %25 = vector.extract_strided_slice %17 {offsets = [0, 1, 0], sizes = [8, 1, 8], strides = [1, 1, 1]} : vector<8x4x8xf32> to vector<8x1x8xf32>
    %26 = vector.shape_cast %25 : vector<8x1x8xf32> to vector<8x8xf32>
    %27 = tpu.transpose %26, [1, 0] : vector<8x8xf32> -> vector<8x8xf32>
    %28 = arith.truncf %27 : vector<8x8xf32> to vector<8x8xbf16>
    %c0_15 = arith.constant 0 : index
    %c1 = arith.constant 1 : index
    %c0_16 = arith.constant 0 : index
    %c0_17 = arith.constant 0 : index
    %29 = vector.load %arg6[%c0_15, %c1, %c0_16, %c0_17] : memref<1x4x8x8xbf16, #tpu.memory_space<vmem>>, vector<1x1x8x8xbf16>
    %30 = vector.shape_cast %29 : vector<1x1x8x8xbf16> to vector<8x8xbf16>
    %31 = vector.shape_cast %28 : vector<8x8xbf16> to vector<1x1x8x8xbf16>
    tpu.vector_store %arg6[%c0_15, %c1, %c0_16, %c0_17], %31 {strides = array<i32>} : memref<1x4x8x8xbf16, #tpu.memory_space<vmem>>, vector<1x1x8x8xbf16>,
    %32 = vector.extract_strided_slice %17 {offsets = [0, 2, 0], sizes = [8, 1, 8], strides = [1, 1, 1]} : vector<8x4x8xf32> to vector<8x1x8xf32>
    %33 = vector.shape_cast %32 : vector<8x1x8xf32> to vector<8x8xf32>
    %34 = tpu.transpose %33, [1, 0] : vector<8x8xf32> -> vector<8x8xf32>
    %35 = arith.truncf %34 : vector<8x8xf32> to vector<8x8xbf16>
    %c0_18 = arith.constant 0 : index
    %c2 = arith.constant 2 : index
    %c0_19 = arith.constant 0 : index
    %c0_20 = arith.constant 0 : index
    %36 = vector.load %arg6[%c0_18, %c2, %c0_19, %c0_20] : memref<1x4x8x8xbf16, #tpu.memory_space<vmem>>, vector<1x1x8x8xbf16>
    %37 = vector.shape_cast %36 : vector<1x1x8x8xbf16> to vector<8x8xbf16>
    %38 = vector.shape_cast %35 : vector<8x8xbf16> to vector<1x1x8x8xbf16>
    tpu.vector_store %arg6[%c0_18, %c2, %c0_19, %c0_20], %38 {strides = array<i32>} : memref<1x4x8x8xbf16, #tpu.memory_space<vmem>>, vector<1x1x8x8xbf16>,
    %39 = vector.extract_strided_slice %17 {offsets = [0, 3, 0], sizes = [8, 1, 8], strides = [1, 1, 1]} : vector<8x4x8xf32> to vector<8x1x8xf32>
    %40 = vector.shape_cast %39 : vector<8x1x8xf32> to vector<8x8xf32>
    %41 = tpu.transpose %40, [1, 0] : vector<8x8xf32> -> vector<8x8xf32>
    %42 = arith.truncf %41 : vector<8x8xf32> to vector<8x8xbf16>
    %c0_21 = arith.constant 0 : index
    %c3 = arith.constant 3 : index
    %c0_22 = arith.constant 0 : index
    %c0_23 = arith.constant 0 : index
    %43 = vector.load %arg6[%c0_21, %c3, %c0_22, %c0_23] : memref<1x4x8x8xbf16, #tpu.memory_space<vmem>>, vector<1x1x8x8xbf16>
    %44 = vector.shape_cast %43 : vector<1x1x8x8xbf16> to vector<8x8xbf16>
    %45 = vector.shape_cast %42 : vector<8x8xbf16> to vector<1x1x8x8xbf16>
    tpu.vector_store %arg6[%c0_21, %c3, %c0_22, %c0_23], %45 {strides = array<i32>} : memref<1x4x8x8xbf16, #tpu.memory_space<vmem>>, vector<1x1x8x8xbf16>,
    %46 = vector.shape_cast %16 : vector<8x32xf32> to vector<8x4x8xf32>
    %47 = tpu.transpose %46, [1, 0, 2] : vector<8x4x8xf32> -> vector<4x8x8xf32>
    %48 = arith.truncf %47 : vector<4x8x8xf32> to vector<4x8x8xbf16>
    %c0_24 = arith.constant 0 : index
    %c0_25 = arith.constant 0 : index
    %c0_26 = arith.constant 0 : index
    %c0_27 = arith.constant 0 : index
    %49 = vector.load %arg7[%c0_24, %c0_25, %c0_26, %c0_27] : memref<1x4x8x8xbf16, #tpu.memory_space<vmem>>, vector<1x4x8x8xbf16>
    %50 = vector.shape_cast %49 : vector<1x4x8x8xbf16> to vector<4x8x8xbf16>
    %51 = vector.shape_cast %48 : vector<4x8x8xbf16> to vector<1x4x8x8xbf16>
    tpu.vector_store %arg7[%c0_24, %c0_25, %c0_26, %c0_27], %51 {strides = array<i32>} : memref<1x4x8x8xbf16, #tpu.memory_space<vmem>>, vector<1x4x8x8xbf16>,
    return
  }
  func.func @transform_0(%arg0: i32) -> (i32, i32, i32) {
    %c0_i32 = arith.constant 0 : i32
    %c0_i32_0 = arith.constant 0 : i32
    %c0_i32_1 = arith.constant 0 : i32
    return %arg0, %c0_i32, %c0_i32_0 : i32, i32, i32
  }
  func.func @transform_1(%arg0: i32) -> (i32, i32) {
    %c0_i32 = arith.constant 0 : i32
    %c0_i32_0 = arith.constant 0 : i32
    %c0_i32_1 = arith.constant 0 : i32
    return %c0_i32, %c0_i32_0 : i32, i32
  }
  func.func @transform_2(%arg0: i32) -> (i32, i32) {
    %c0_i32 = arith.constant 0 : i32
    %c0_i32_0 = arith.constant 0 : i32
    %c0_i32_1 = arith.constant 0 : i32
    return %c0_i32, %c0_i32_0 : i32, i32
  }
  func.func @transform_3(%arg0: i32) -> (i32, i32) {
    %c0_i32 = arith.constant 0 : i32
    %c0_i32_0 = arith.constant 0 : i32
    %c0_i32_1 = arith.constant 0 : i32
    return %c0_i32, %c0_i32_0 : i32, i32
  }
  func.func @transform_4(%arg0: i32) -> (i32, i32) {
    %c0_i32 = arith.constant 0 : i32
    %c0_i32_0 = arith.constant 0 : i32
    %c0_i32_1 = arith.constant 0 : i32
    return %c0_i32, %c0_i32_0 : i32, i32
  }
  func.func @transform_5(%arg0: i32) -> (i32, i32, i32, i32) {
    %c0_i32 = arith.constant 0 : i32
    %c0_i32_0 = arith.constant 0 : i32
    %c0_i32_1 = arith.constant 0 : i32
    %c0_i32_2 = arith.constant 0 : i32
    return %arg0, %c0_i32, %c0_i32_0, %c0_i32_1 : i32, i32, i32, i32
  }
  func.func @transform_6(%arg0: i32) -> (i32, i32, i32, i32) {
    %c0_i32 = arith.constant 0 : i32
    %c0_i32_0 = arith.constant 0 : i32
    %c0_i32_1 = arith.constant 0 : i32
    %c0_i32_2 = arith.constant 0 : i32
    return %arg0, %c0_i32, %c0_i32_0, %c0_i32_1 : i32, i32, i32, i32
  }
}

</mosaic_0001>

<bundles_post_ra>
// kernel: tpu_custom_call.1
= control target key start
LH: loop header
LB: loop body
LE: loop exit
PB: predicated region body
PF: predicated region fallthrough
CT: control target
= control target key end

     0   :  { %s1799_s0 = inlined_call_operand.hbm [shape: f32[2,8,32], index: 0, kind: input, shape index: {}]   ;;  %s1800_s1 = inlined_call_operand.hbm [shape: bf16[32,32], index: 1, kind: input, shape index: {}]   ;;  %s1801_s2 = inlined_call_operand.vmem [shape: f32[1,32], index: 2, kind: input, shape index: {}]   ;;  %s1802_s3 = inlined_call_operand.hbm [shape: bf16[32,32], index: 3, kind: input, shape index: {}]   ;;  %s1803_s4 = inlined_call_operand.vmem [shape: f32[1,32], index: 4, kind: input, shape index: {}]   ;;  %s1804_s5 = inlined_call_operand.hbm [shape: bf16[2,4,8,8], index: 5, kind: output, shape index: {0}]   ;;  %s1805_s6 = inlined_call_operand.hbm [shape: bf16[2,4,8,8], index: 6, kind: output, shape index: {1}]  }
   0x1   :  { %1810 = sst [smem:[#allocation15_spill]] %s1800_s1 }
   0x2   :  { %12 = vsyncpa [#allocation3], 0 }
   0x3   :  { %14 = vsyncpa [#allocation3 + $0x1], 0 }
   0x4   :  { %15 = vsyncpa [#allocation6], 0 }
   0x5   :  { %16 = vsyncpa [#allocation4], 0 }
   0x6   :  { %18 = vsyncpa [#allocation4 + $0x1], 0 }
   0x7   :  { %19 = vsyncpa [#allocation10], 0 }
   0x8   :  { %21 = vsyncpa [#allocation10 + $0x1], 0  ;;  %s1436_s21 = smov 0   ;;  %s1438_s22 = smov 0  }
   0x9   :  { %s1440_s23 = smov 0   ;;  %s1442_s24 = smov 0  }
   0xa LB: > { %s1457_s25 = sadd.s32 4294967295, %s1383_s24   ;;  %s1046_s26 = sadd.s32 4294967294, %s1383_s24   ;;  %s1383_s24 = sphi %s1442_s24, %s1829_s24   ;;  %s1379_s23 = sphi %s1440_s23, %s1828_s23   ;;  %s1375_s22 = sphi %s1438_s22, %s1827_s22   ;;  %s1371_s21 = sphi %s1436_s21, %s1826_s21  }
   0xb   : > { %p47_p0 = scmp.ne.s32.totalorder %s1375_s22, %s1371_s21  ;;  %p1806_p1 = scmp.eq.s32.totalorder %s1457_s25, 0 }
   0xc   : > { %p161_p3 = scmp.eq.s32.totalorder %s1046_s26, 1  ;;  %p1047_p5 = scmp.ge.s32.totalorder %s1383_s24, 1 }
   0xd   : > { %p1466_p4 = por %p1806_p1, %p47_p0  ;;  %p194_p7 = scmp.lt.s32.totalorder %s1383_s24, 3 }
   0xe   : > { %p1471_p6 = por %p161_p3, %p47_p0  ;;  %s1385_s30 = smov [#allocation5]  }
   0xf   : > { %s1811_s27 = scalar_select %p1466_p4, 1, 0 }
  0x10   : > { %s1812_s28 = scalar_select %p1471_p6, 1, 0 }
  0x11   : > { %p1476_p8 = pnand %p1047_p5, %p194_p7  ;;  %s206_s7 = sshll.u32 %s1385_s30, 4  ;;  %s207_s7 = int_to_ptr.vmem [resolvable:$true] %s206_s7 }
  0x12   : > { %s1386_s9 = smov [#allocation7]   ;;  %s1216_s11 = scalar_lea.vmem %s207_s7, 256 }
  0x13   : > { %s1813_s29 = scalar_select %p1476_p8, 1, 0 }
  0x14   : > { %p1118_p9 = pneg %p1476_p8  ;;  %s222_s10 = sshll.u32 %s1386_s9, 4  ;;  %s223_s10 = int_to_ptr.vmem [resolvable:$true] %s222_s10 }
  0x15   : > { %p1217_p13 = scmp.ne.s32.totalorder %s207_s7, %s1216_s11  ;;  %p1224_p5 = scmp.lt.s32.totalorder %s207_s7, %s207_s7 }
  0x16   : > { %p1485_p11 = pnand %p1118_p9, %p1806_p1  ;;  %p1225_p7 = scmp.lt.s32.totalorder %s1216_s11, %s1216_s11 }
  0x18   : > { %p1207_p12 = pneg %p1485_p11  ;;  %p1226_p10 = por %p1225_p7, %p1224_p5 }
  0x1a   : > { %p1219_p0 = pnand %p1217_p13, %p1207_p12 }
  0x1c   : > { %p1220_p3 = pneg %p1219_p0 }
  0x1e   : > { %p1227_p9 = pnand %p1226_p10, %p1220_p3 }
  0x20   : > { %1230 = shalt.err (!%p1227_p9)
}
  0x21   : > { %s1387_s12 = smov 64   ;;  %s1388_s13 = smov 4  }
  0x22   : > { %s1815_s1 = sld [smem:[#allocation15_spill]]  ;;  %s1242_s16 = scalar_lea.vmem %s223_s10, 256 }
  0x23   : > { %p1243_p1 = scmp.ne.s32.totalorder %s223_s10, %s1242_s16  ;;  %p1250_p2 = scmp.lt.s32.totalorder %s223_s10, %s223_s10 }
  0x24   : > { %p1251_p6 = scmp.lt.s32.totalorder %s1242_s16, %s1242_s16 }
  0x25   : > { %p1245_p13 = pnand %p1243_p1, %p1207_p12 }
  0x26   : > { %p1252_p5 = por %p1251_p6, %p1250_p2 }
  0x27   : > { %p1246_p0 = pneg %p1245_p13 }
  0x28   : > { %1121 = dma.hbm_to_vmem [thread:$0]  (!%p1485_p11), %s1815_s1, 256, %s207_s7, [#allocation6], %s1387_s12, %s1387_s12, %s1388_s13  }
  0x29   : > { %p1253_p10 = pnand %p1252_p5, %p1246_p0 }
  0x2b   : > { %1256 = shalt.err (!%p1253_p10)
}
  0x2c   : > { %1124 = dma.hbm_to_vmem [thread:$0]  (!%p1485_p11), %s1802_s3, 256, %s223_s10, [#allocation6], %s1387_s12, %s1387_s12, %s1388_s13  }
  0x2d   : > { %s1508_s19 = sadd.s32 1, %s1383_s24   ;;  %s34_s20 = sadd.s32 1, %s1379_s23 }
  0x2e   : > { %s31_s26 = ssub.s32 %s1383_s24, %s1508_s19  ;;  %p41_p1 = scmp.ne.s32.totalorder %s1379_s23, %s1375_s22 }
  0x2f   : > { %p32_p2 = scmp.eq.s32.totalorder %s31_s26, 0  ;;  %p42_p6 = scmp.eq.s32.totalorder %s1383_s24, 0 }
  0x30   : > { %p1816_p12 = scmp.eq.s32.totalorder %s1457_s25, 1  ;;  %p1138_p7 = scmp.lt.s32.totalorder %s1383_s24, 2 }
  0x31   : > { %s1524_s7 = scalar_select %p32_p2, %s1379_s23, %s34_s20  }
  0x32   : > { %p1518_p3 = por %p1816_p12, %p41_p1  ;;  %p43_p9 = por %p42_p6, %p41_p1 }
  0x33   : > { %s239_s8 = sand.u32 1, %s1379_s23   ;;  %s1052_s10 = sshll.u32 %s1383_s24, 7 }
  0x34   : > { %s1817_s30 = scalar_select %p1518_p3, 1, 0 }
  0x35   : > { %s1051_s9 = sshll.u32 %s239_s8, 3  ;;  %s1531_s13 = scalar_lea.hbm %s1799_s0, %s1052_s10 }
  0x36   : > { %s243_s14 = scalar_lea.vmem [#allocation2], %s1051_s9  ;;  %p1533_p11 = pnand %p1138_p7, %p43_p9 }
  0x37   : > { %s250_s15 = sshll.u32 %s243_s14, 4  ;;  %s240_s17 = scalar_lea.sflag [#allocation3], %s239_s8  ;;  %s251_s15 = int_to_ptr.vmem [resolvable:$true] %s250_s15 }
  0x38   : > { %s1257_s18 = scalar_lea.hbm %s1531_s13, 128  ;;  %p1259_p0 = pneg %p1533_p11 }
  0x39   : > { %p1258_p13 = scmp.ne.s32.totalorder %s1531_s13, %s1257_s18  ;;  %s1262_s10 = scalar_lea.hbm %s1799_s0, 256 }
  0x3a   : > { %p1263_p1 = scmp.lt.s32.totalorder %s1531_s13, %s1799_s0  ;;  %p1264_p2 = scmp.lt.s32.totalorder %s1262_s10, %s1257_s18 }
  0x3b   : > { %p1260_p5 = pnand %p1259_p0, %p1258_p13 }
  0x3c   : > { %p1265_p6 = por %p1264_p2, %p1263_p1 }
  0x3d   : > { %p1261_p10 = pneg %p1260_p5 }
  0x3f   : > { %p1266_p12 = pnand %p1265_p6, %p1261_p10 }
  0x41   : > { %1269 = shalt.err (!%p1266_p12)
}
  0x42   : > { %s1270_s12 = scalar_lea.vmem %s251_s15, 128  ;;  %s1389_s8 = smov [#allocation2]  }
  0x43   : > { %p1271_p7 = scmp.ne.s32.totalorder %s251_s15, %s1270_s12  ;;  %s1275_s14 = sshll.u32 %s1389_s8, 4  ;;  %s1276_s14 = int_to_ptr.vmem [resolvable:$false] %s1275_s14 }
  0x44   : > { %s1277_s1 = scalar_lea.vmem %s1276_s14, 256  ;;  %p1278_p13 = scmp.lt.s32.totalorder %s251_s15, %s1276_s14 }
  0x45   : > { %p1273_p9 = pnand %p1271_p7, %p1259_p0  ;;  %p1279_p5 = scmp.lt.s32.totalorder %s1277_s1, %s1270_s12 }
  0x47   : > { %p1274_p3 = pneg %p1273_p9  ;;  %p1280_p4 = por %p1279_p5, %p1278_p13 }
  0x49   : > { %p1281_p8 = pnand %p1280_p4, %p1274_p3 }
  0x4b   : > { %1284 = shalt.err (!%p1281_p8)
}
  0x4c   : > { %1128 = dma.hbm_to_vmem [thread:$0]  (!%p1533_p11), %s1531_s13, 128, %s251_s15, %s240_s17  }
  0x4d   : > { %p1819_p10 = scmp.ne.s32.totalorder %s1813_s29, 0 }
  0x4e   : > { %s1554_s18 = sand.u32 (!%p1819_p10), 1, %s1375_s22   ;;  %p1820_p0 = scmp.ne.s32.totalorder (!%p1819_p10), %s1811_s27, 0 }
  0x4f   : > { %259 = sbr.rel (%p1819_p10) target bundleno = 590 (0x24e), region = 40  ;;  %s1054_s20 = sshll.u32 (!%p1819_p10), %s1554_s18, 3 }
  0x50   : > { %s262_s26 = scalar_lea.sflag (!%p1819_p10), [#allocation3], %s1554_s18  ;;  %s265_s10 = scalar_lea.vmem (!%p1819_p10), [#allocation2], %s1054_s20 }
  0x54   : > { %1354 = dma.done.wait (%p1820_p0), %s262_s26, 128  }
  0x55   : > { %1356 = vsyncadd (%p1820_p0), %s262_s26, 4294967168  ;;  %p1821_p4 = scmp.eq.s32.totalorder %s1457_s25, 0 }
  0x57   : > { %1358 = dma.done.wait (%p1821_p4), [#allocation6], 512   ;;  %p1822_p8 = pmov %p1821_p4 }
  0x58   : > { %v1390_v0 = vmov 0.0   ;;  %vm1391_vm0 = vmmov 0   ;;  %v1201_v1 = vld [vmem:[#allocation5 + $0x8] sm:$0xff]   ;;  %v1202_v2 = vld [vmem:[#allocation5] sm:$0xff]   ;;  %v1203_v3 = vld [vmem:[#allocation7 + $0x8] sm:$0xff]   ;;  %vm333_vm1 = vcmask 261120   ;;  %v455_v21 = vlaneseq }
  0x59   : > { %1360 = vsyncadd (%p1822_p8), [#allocation6], 4294966784  ;;  %1088 = vmatprep.subr.bf16.mxu0 %v1390_v0  ;;  %1096 = vmatprep.subr.bf16.mxu1 %v1390_v0  ;;  %v308_v4 = vld [vmem:[%s265_s10] sm:$0xff]  ;;  %s1392_s15 = smov 104   ;;  %s1393_s16 = smov 120   ;;  %vm527_vm2 = vcmask 1041409  }
  0x5a   : > { %1092 = vmatprep.mubr.msk.bf16.mxu0 %vm1391_vm0, %v1390_v0  ;;  %1100 = vmatprep.mubr.msk.bf16.mxu1 %vm1391_vm0, %v1390_v0  ;;  %v1204_v5 = vld [vmem:[#allocation7] sm:$0xff]   ;;  %v309_v6 = vpack.c.bf16 %v308_v4, %v308_v4  ;;  %s1394_s17 = smov 112   ;;  %v1395_v19 = vmov 1983009808   ;;  %v1396_v22 = vmov 1934713408  }
  0x5b   : > { %1089 = vmatpush3.bf16.msra.mxu0 %v1201_v1  ;;  %1097 = vmatpush3.bf16.msra.mxu1 %v1203_v3  ;;  %v1059_v7 = vld [vmem:[%s1801_s2] ss:$0 sm:$0xff]  ;;  %v453_v20 = vunpack.c.l.s4 %v1395_v19  ;;  %v485_v23 = vunpack.c.l.s4 %v1396_v22  ;;  %v456_v25 = vshrl.u32 %v455_v21, 7  ;;  %vm530_vm3 = vcmask 1042434   ;;  %s1057_s11 = sshll.u32 %s1554_s18, 4  ;;  %s1080_s12 = sshll.u32 %s1457_s25, 8 }
  0x5c   : > { %1090 = vmatprep.subr.bf16.mxu0 %v1390_v0  ;;  %1098 = vmatprep.subr.bf16.mxu1 %v1390_v0  ;;  %v1063_v9 = vld [vmem:[%s1803_s4] ss:$0 sm:$0xff]  ;;  %vm533_vm4 = vcmask 1043459   ;;  %vm536_vm5 = vcmask 1044484   ;;  %vm539_vm6 = vcmask 1045509   ;;  %vm542_vm7 = vcmask 1046534   ;;  %s1711_s20 = scalar_lea.hbm %s1805_s6, %s1080_s12 }
  0x5d   : > { %v454_v24 = vunpack.c.0.s8 %v453_v20  ;;  %v486_v28 = vunpack.c.0.s8 %v485_v23  ;;  %vm581_vm8 = vcmask 60416   ;;  %vm545_vm9 = vcmask 1047559   ;;  %s1671_s9 = scalar_lea.vmem [#allocation9], %s1057_s11  ;;  %s893_s10 = scalar_lea.sflag [#allocation10], %s1554_s18 }
  0x5e   : > { %s922_s26 = sshll.u32 %s1671_s9, 4  ;;  %p1823_p11 = scmp.ne.s32.totalorder %s1817_s30, 0  ;;  %s1714_s26 = int_to_ptr.vmem [resolvable:$true] %s922_s26 }
  0x5f   : > { %1091 = vmatpush3.bf16.msra.mxu0 %v1202_v2  ;;  %1099 = vmatpush3.bf16.msra.mxu1 %v1204_v5  ;;  %v1578_v29 = vsub.s32 %v454_v24, %v456_v25  ;;  %v1580_v36 = vsub.s32 %v486_v28, %v456_v25  ;;  %s1285_s1 = scalar_lea.vmem %s1714_s26, 256  ;;  %s1397_s27 = smov [#allocation9]  }
  0x60   : > { %p1286_p3 = scmp.ne.s32.totalorder %s1714_s26, %s1285_s1  ;;  %s1289_s29 = sshll.u32 %s1397_s27, 4  ;;  %s1290_s29 = int_to_ptr.vmem [resolvable:$false] %s1289_s29 }
  0x61   : > { %s1291_s13 = scalar_lea.vmem %s1290_s29, 512  ;;  %p1292_p6 = scmp.lt.s32.totalorder %s1714_s26, %s1290_s29 }
  0x62   : > { %1093 = vmatmul.mubr.msk.bf16.vlgmr.msra.gmra.mxu0 %vm333_vm1, %v309_v6  ;;  %1101 = vmatmul.mubr.msk.bf16.vlgmr.msra.gmra.mxu1 %vm333_vm1, %v309_v6  ;;  %p1287_p1 = pnand %p1286_p3, %p1823_p11  ;;  %p1293_p12 = scmp.lt.s32.totalorder %s1291_s13, %s1285_s1 }
  0x64   : > { %p1288_p2 = pneg %p1287_p1  ;;  %p1294_p7 = por %p1293_p12, %p1292_p6 }
  0x66   : > { %p1295_p9 = pnand %p1294_p7, %p1288_p2 }
 0x122   : > { %v371_v8 = vpop.f32.mrf.mxu0  ;;  %v434_v12 = vpop.f32.mrf.mxu1 }
 0x123   : > { %v372_v10 = vadd.f32 %v1059_v7, %v371_v8  ;;  %v435_v13 = vadd.f32 %v1063_v9, %v434_v12 }
 0x124   : > { %v1094_v11 = vpop.f32.mrf.mxu0  ;;  %v1102_v15 = vpop.f32.mrf.mxu1 }
 0x125   : > { %447 = vrot.lane.b32.xlu1 %v372_v10, %s1392_s15  ;;  %441 = vrot.lane.b32.xlu0 %v372_v10, %s1393_s16 }
 0x126   : > { %v374_v14 = vpop.f32.mrf.mxu0  ;;  %v437_v17 = vpop.f32.mrf.mxu1 }
 0x128   : > { %v1095_v16 = vpop.f32.mrf.mxu0  ;;  %v1103_v18 = vpop.f32.mrf.mxu1 }
 0x129   : > { %734 = vrot.lane.b32.xlu1 %v435_v13, %s1393_s16  ;;  %444 = vrot.lane.b32.xlu0 %v372_v10, %s1394_s17 }
 0x12d   : > { %740 = vrot.lane.b32.xlu1 %v435_v13, %s1392_s15  ;;  %737 = vrot.lane.b32.xlu0 %v435_v13, %s1394_s17 }
 0x197   : > { %v448_v26 = vpop.permute.xlu1 %447  ;;  %v442_v27 = vpop.permute.xlu0 %441 }
 0x198   : > { %v466_v30 = vcombine.low %v442_v27, %v448_v26  ;;  %v467_v31 = vcombine.high %v442_v27, %v448_v26 }
 0x19a   : > { %v474_v37 = vrot.slane %v466_v30, %v1578_v29  ;;  %v481_v38 = vrot.slane %v467_v31, %v1578_v29 }
 0x19b   : > { %v735_v32 = vpop.permute.xlu1 %734  ;;  %v445_v33 = vpop.permute.xlu0 %444 }
 0x19c   : > { %v450_v34 = vcombine.low %v372_v10, %v445_v33  ;;  %v451_v35 = vcombine.high %v372_v10, %v445_v33 }
 0x19e   : > { %v458_v39 = vrot.slane %v450_v34, %v1578_v29  ;;  %v465_v40 = vrot.slane %v451_v35, %v1578_v29 }
 0x19f   : > { %v741_v41 = vpop.permute.xlu1 %740  ;;  %v738_v42 = vpop.permute.xlu0 %737 }
 0x1a0   : > { %v482_v43 = vcombine.low %v458_v39, %v474_v37  ;;  %v483_v44 = vcombine.high %v458_v39, %v474_v37  ;;  %v498_v45 = vcombine.low %v465_v40, %v481_v38  ;;  %v499_v46 = vcombine.high %v465_v40, %v481_v38 }
 0x1a1   : > { %v759_v47 = vcombine.low %v735_v32, %v741_v41  ;;  %v760_v48 = vcombine.high %v735_v32, %v741_v41  ;;  %v743_v49 = vcombine.low %v435_v13, %v738_v42  ;;  %v744_v50 = vcombine.high %v435_v13, %v738_v42 }
 0x1a2   : > { %v1587_v51 = vrot.slane %v482_v43, %v1580_v36  ;;  %v1590_v52 = vrot.slane %v483_v44, %v1580_v36  ;;  %v1593_v53 = vrot.slane %v498_v45, %v1580_v36  ;;  %v1596_v54 = vrot.slane %v499_v46, %v1580_v36 }
 0x1a3   : > { %v767_v55 = vrot.slane %v759_v47, %v1578_v29  ;;  %v774_v56 = vrot.slane %v760_v48, %v1578_v29  ;;  %v751_v57 = vrot.slane %v743_v49, %v1578_v29  ;;  %v758_v58 = vrot.slane %v744_v50, %v1578_v29 }
 0x1a4   : > { %v1604_v59 = vcombine.high %v1587_v51, %v1390_v0  ;;  %v583_v60 = vrot.slane %v1587_v51, 1  ;;  %v633_v61 = vrot.slane %v1587_v51, 2  ;;  %v683_v62 = vrot.slane %v1587_v51, 3 }
 0x1a5   : > { %v775_v63 = vcombine.low %v751_v57, %v767_v55  ;;  %v776_v1 = vcombine.high %v751_v57, %v767_v55  ;;  %v791_v2 = vcombine.low %v758_v58, %v774_v56  ;;  %v792_v3 = vcombine.high %v758_v58, %v774_v56 }
 0x1a6   : > { %v1611_v4 = vcombine.high %v1590_v52, %v1390_v0  ;;  %v1615_v5 = vcombine.high %v1593_v53, %v1390_v0  ;;  %v1619_v6 = vcombine.high %v1596_v54, %v1390_v0  ;;  %v634_v7 = vrot.slane %v1604_v59, 1 }
 0x1a7   : > { %v783_v8 = vrot.slane %v775_v63, %v1580_v36  ;;  %v790_v9 = vrot.slane %v776_v1, %v1580_v36  ;;  %v799_v10 = vrot.slane %v791_v2, %v1580_v36  ;;  %v806_v11 = vrot.slane %v792_v3, %v1580_v36 }
 0x1a8   : > { %v635_v12 = vsel %vm527_vm2, %v634_v7, %v633_v61  ;;  %v637_v13 = vrot.slane %v1611_v4, 7  ;;  %v639_v14 = vrot.slane %v1593_v53, 6  ;;  %v641_v0 = vrot.slane %v1615_v5, 5 }
 0x1a9   : > { %v811_v15 = vcombine.low %v783_v8, %v790_v9  ;;  %v1070_v16 = vcombine.high %v783_v8, %v790_v9  ;;  %v827_v17 = vcombine.low %v799_v10, %v806_v11  ;;  %v1071_v18 = vcombine.high %v799_v10, %v806_v11 }
 0x1aa   : > { %v636_v19 = vsel %vm530_vm3, %v1590_v52, %v635_v12  ;;  %v643_v20 = vrot.slane %v1596_v54, 4  ;;  %v645_v21 = vrot.slane %v1619_v6, 3  ;;  %v684_v22 = vrot.slane %v1604_v59, 2 }
 0x1ab   : > { %v818_v23 = vrot.slane %v811_v15, %v1578_v29  ;;  %v826_v24 = vrot.slane %v1070_v16, %v1578_v29  ;;  %v834_v25 = vrot.slane %v827_v17, %v1578_v29  ;;  %v842_v26 = vrot.slane %v1071_v18, %v1578_v29 }
 0x1ac   : > { %v638_v27 = vsel %vm533_vm4, %v637_v13, %v636_v19  ;;  %v685_v28 = vsel %vm527_vm2, %v684_v22, %v683_v62  ;;  %v686_v30 = vrot.slane %v1590_v52, 1  ;;  %v689_v31 = vrot.slane %v1593_v53, 7 }
 0x1ad   : > { %v843_v32 = vcombine.low %v818_v23, %v826_v24  ;;  %v844_v33 = vcombine.high %v818_v23, %v826_v24  ;;  %v859_v34 = vcombine.low %v834_v25, %v842_v26  ;;  %v860_v35 = vcombine.high %v834_v25, %v842_v26 }
 0x1ae   : > { %v640_v37 = vsel %vm536_vm5, %v639_v14, %v638_v27  ;;  %v687_v38 = vsel %vm530_vm3, %v686_v30, %v685_v28  ;;  %v691_v29 = vrot.slane %v1615_v5, 6  ;;  %v693_v39 = vrot.slane %v1596_v54, 5 }
 0x1af   : > { %v851_v40 = vrot.slane %v843_v32, %v1580_v36  ;;  %v858_v41 = vrot.slane %v844_v33, %v1580_v36  ;;  %v867_v42 = vrot.slane %v859_v34, %v1580_v36  ;;  %v874_v43 = vrot.slane %v860_v35, %v1580_v36 }
 0x1b0   : > { %v642_v44 = vsel %vm539_vm6, %v641_v0, %v640_v37  ;;  %v688_v45 = vsel %vm533_vm4, %v1611_v4, %v687_v38  ;;  %v695_v46 = vrot.slane %v1619_v6, 4  ;;  %v526_v47 = vrot.slane %v1604_v59, 7 }
 0x1b1   : > { %v875_v48 = vcombine.low %v851_v40, %v867_v42  ;;  %v876_v49 = vcombine.high %v851_v40, %v867_v42  ;;  %v877_v50 = vcombine.low %v858_v41, %v874_v43  ;;  %v878_v55 = vcombine.high %v858_v41, %v874_v43 }
 0x1b2   : > { %v644_v56 = vsel %vm542_vm7, %v643_v20, %v642_v44  ;;  %v690_v57 = vsel %vm536_vm5, %v689_v31, %v688_v45  ;;  %v528_v36 = vsel %vm527_vm2, %v526_v47, %v1587_v51  ;;  %v529_v58 = vrot.slane %v1590_v52, 6 }
 0x1b3   : > { %v879_v61 = vpack.c.bf16 %v875_v48, %v875_v48  ;;  %v880_v62 = vpack.c.bf16 %v876_v49, %v876_v49  ;;  %v881_v63 = vpack.c.bf16 %v877_v50, %v877_v50  ;;  %v882_v1 = vpack.c.bf16 %v878_v55, %v878_v55 }
 0x1b4   : > { %v646_v2 = vsel %vm545_vm9, %v645_v21, %v644_v56  ;;  %v692_v3 = vsel %vm539_vm6, %v691_v29, %v690_v57  ;;  %v531_v7 = vsel %vm530_vm3, %v529_v58, %v528_v36  ;;  %v532_v8 = vrot.slane %v1611_v4, 5 }
 0x1b5   : > { %v694_v9 = vsel %vm542_vm7, %v693_v39, %v692_v3  ;;  %v535_v10 = vrot.slane %v1593_v53, 4  ;;  %v538_v11 = vrot.slane %v1615_v5, 3  ;;  %883 = vst.msk [vmem:[%s1671_s9] sm:$0xf] %vm581_vm8, %v879_v61  ;;  %884 = vst.msk [vmem:[%s1671_s9 + $0x4] sm:$0xf] %vm581_vm8, %v880_v62  ;;  %v584_v0 = vsel %vm527_vm2, %v1604_v59, %v583_v60 }
 0x1b6   : > { %885 = vst.msk [vmem:[%s1671_s9 + $0x8] sm:$0xf] %vm581_vm8, %v881_v63  ;;  %886 = vst.msk [vmem:[%s1671_s9 + $0xc] sm:$0xf] %vm581_vm8, %v882_v1  ;;  %v696_v12 = vsel %vm545_vm9, %v695_v46, %v694_v9  ;;  %v534_v13 = vsel %vm533_vm4, %v532_v8, %v531_v7  ;;  %v541_v14 = vrot.slane %v1596_v54, 2  ;;  %v585_v17 = vrot.slane %v1590_v52, 7 }
 0x1b7   : > { %v1194_v15 = vpack.i.bf16 %v696_v12, %v646_v2  ;;  %v537_v16 = vsel %vm536_vm5, %v535_v10, %v534_v13  ;;  %v587_v18 = vrot.slane %v1611_v4, 6  ;;  %v589_v51 = vrot.slane %v1593_v53, 5 }
 0x1b8   : > { %v540_v19 = vsel %vm539_vm6, %v538_v11, %v537_v16  ;;  %v586_v21 = vsel %vm530_vm3, %v585_v17, %v584_v0  ;;  %v544_v59 = vrot.slane %v1619_v6, 1  ;;  %v591_v52 = vrot.slane %v1615_v5, 4 }
 0x1b9   : > { %1195 = vxpose.xlu1.b32.start.end [1/1] (short) (narrow) %v1194_v15, 8  ;;  %v543_v20 = vsel %vm542_vm7, %v541_v14, %v540_v19  ;;  %v588_v60 = vsel %vm533_vm4, %v587_v18, %v586_v21  ;;  %v593_v22 = vrot.slane %v1596_v54, 3  ;;  %v595_v25 = vrot.slane %v1619_v6, 2 }
 0x1ba   : > { %v590_v4 = vsel %vm536_vm5, %v589_v51, %v588_v60  ;;  %v546_v23 = vsel %vm545_vm9, %v544_v59, %v543_v20 }
 0x1bb   : > { %v592_v24 = vsel %vm539_vm6, %v591_v52, %v590_v4 }
 0x1bc   : > { %v594_v53 = vsel %vm542_vm7, %v593_v22, %v592_v24 }
 0x1bd   : > { %v596_v26 = vsel %vm545_vm9, %v595_v25, %v594_v53 }
 0x1be   : > { %v1187_v27 = vpack.i.bf16 %v596_v26, %v546_v23 }
 0x1c0   : > { %1188 = vxpose.xlu0.b32.start.end [1/1] (short) (narrow) %v1187_v27, 8 }
 0x1c1   : > { %1298 = shalt.err (!%p1295_p9)
}
 0x1c2   : > { %s1299_s15 = scalar_lea.hbm %s1711_s20, 256  ;;  %s1303_s9 = scalar_lea.hbm %s1805_s6, 512 }
 0x1c3   : > { %p1300_p13 = scmp.ne.s32.totalorder %s1711_s20, %s1299_s15  ;;  %p1304_p0 = scmp.lt.s32.totalorder %s1711_s20, %s1805_s6 }
 0x1c4   : > { %p1305_p4 = scmp.lt.s32.totalorder %s1303_s9, %s1299_s15 }
 0x1c5   : > { %p1301_p5 = pnand %p1300_p13, %p1823_p11 }
 0x1c6   : > { %p1306_p8 = por %p1305_p4, %p1304_p0 }
 0x1c7   : > { %p1302_p10 = pneg %p1301_p5 }
 0x1c9   : > { %p1307_p3 = pnand %p1306_p8, %p1302_p10 }
 0x1cb   : > { %1310 = shalt.err (!%p1307_p3)
}
 0x1cc   : > { %s1398_s1 = smov 64   ;;  %s1399_s27 = smov 4  }
 0x1cd   : > { %1115 = dma.vmem_to_hbm [thread:$0]  (%p1823_p11), %s1714_s26, 256, %s1711_s20, %s893_s10, %s1398_s1, %s1398_s1, %s1399_s27  }
 0x1ce   : > { %s299_s29 = scalar_lea.vmem [#allocation8], %s1057_s11  ;;  %s1751_s10 = scalar_lea.hbm %s1804_s5, %s1080_s12 }
 0x1cf   : > { %s906_s13 = sshll.u32 %s299_s29, 4  ;;  %s888_s11 = scalar_lea.sflag [#allocation4], %s1554_s18  ;;  %s1753_s13 = int_to_ptr.vmem [resolvable:$true] %s906_s13 }
 0x1d0   : > { %s1311_s15 = scalar_lea.vmem %s1753_s13, 256  ;;  %s1400_s25 = smov [#allocation8]  }
 0x1d1   : > { %p1312_p1 = scmp.ne.s32.totalorder %s1753_s13, %s1311_s15  ;;  %s1315_s16 = sshll.u32 %s1400_s25, 4  ;;  %s1316_s16 = int_to_ptr.vmem [resolvable:$false] %s1315_s16 }
 0x1d2   : > { %s1317_s12 = scalar_lea.vmem %s1316_s16, 512  ;;  %p1318_p12 = scmp.lt.s32.totalorder %s1753_s13, %s1316_s16 }
 0x1d3   : > { %p1313_p2 = pnand %p1312_p1, %p1823_p11  ;;  %p1319_p7 = scmp.lt.s32.totalorder %s1317_s12, %s1311_s15 }
 0x1d5   : > { %p1314_p6 = pneg %p1313_p2  ;;  %p1320_p9 = por %p1319_p7, %p1318_p12 }
 0x1d7   : > { %p1321_p13 = pnand %p1320_p9, %p1314_p6 }
 0x235   : > { %v1196_v54 = vpop.trf.xlu1 }
 0x236   : > { %v1200_v5 = vunpack.i.h.bf16 %v1196_v54  ;;  %v1197_v6 = vunpack.i.l.bf16 %v1196_v54 }
 0x238   : > { %v730_v28 = vpack.c.bf16 %v1200_v5, %v1200_v5  ;;  %v680_v30 = vpack.c.bf16 %v1197_v6, %v1197_v6 }
 0x23a   : > { %1069 = vst.msk [vmem:[%s299_s29 + $0xc] sm:$0xf] %vm581_vm8, %v730_v28  ;;  %1068 = vst.msk [vmem:[%s299_s29 + $0x8] sm:$0xf] %vm581_vm8, %v680_v30 }
 0x23c   : > { %v1189_v31 = vpop.trf.xlu0 }
 0x23d   : > { %v1193_v32 = vunpack.i.h.bf16 %v1189_v31  ;;  %v1190_v33 = vunpack.i.l.bf16 %v1189_v31 }
 0x23f   : > { %v630_v34 = vpack.c.bf16 %v1193_v32, %v1193_v32  ;;  %v580_v35 = vpack.c.bf16 %v1190_v33, %v1190_v33 }
 0x241   : > { %1067 = vst.msk [vmem:[%s299_s29 + $0x4] sm:$0xf] %vm581_vm8, %v630_v34  ;;  %582 = vst.msk [vmem:[%s299_s29] sm:$0xf] %vm581_vm8, %v580_v35 }
 0x242   : > { %1324 = shalt.err (!%p1321_p13)
}
 0x243   : > { %s1325_s17 = scalar_lea.hbm %s1751_s10, 256  ;;  %s1329_s8 = scalar_lea.hbm %s1804_s5, 512 }
 0x244   : > { %p1326_p5 = scmp.ne.s32.totalorder %s1751_s10, %s1325_s17  ;;  %p1330_p4 = scmp.lt.s32.totalorder %s1751_s10, %s1804_s5 }
 0x245   : > { %p1331_p8 = scmp.lt.s32.totalorder %s1329_s8, %s1325_s17 }
 0x246   : > { %p1327_p10 = pnand %p1326_p5, %p1823_p11 }
 0x247   : > { %p1332_p3 = por %p1331_p8, %p1330_p4 }
 0x248   : > { %p1328_p0 = pneg %p1327_p10 }
 0x24a   : > { %p1333_p1 = pnand %p1332_p3, %p1328_p0 }
 0x24c   : > { %1336 = shalt.err (!%p1333_p1)
}
 0x24d   : > { %1114 = dma.vmem_to_hbm [thread:$0]  (%p1823_p11), %s1753_s13, 256, %s1751_s10, %s888_s11, %s1398_s1, %s1398_s1, %s1399_s27  }
 0x24e PF: > { %s937_s20 = sand.u32 1, %s1371_s21   ;;  %p1824_p2 = scmp.ne.s32.totalorder %s1812_s28, 0 }
 0x24f   : > { %p1825_p6 = scmp.ge.s32.totalorder %s1383_s24, 2  ;;  %s938_s26 = scalar_lea.sflag [#allocation4], %s937_s20 }
 0x251   : > { %p1130_p12 = pnand %p1825_p6, %p1824_p2 }
 0x253   : > { %p1131_p7 = pneg %p1130_p12 }
 0x255   : > { %1362 = dma.done.wait (%p1131_p7), %s938_s26, 256  }
 0x256   : > { %1364 = vsyncadd (%p1131_p7), %s938_s26, 4294967040  ;;  %s947_s15 = scalar_lea.sflag [#allocation10], %s937_s20 }
 0x257   : > { %1366 = dma.done.wait (%p1131_p7), %s947_s15, 256  }
 0x258   : > { %1368 = vsyncadd (%p1131_p7), %s947_s15, 4294967040  ;;  %p24_p11 = scmp.ge.s32.totalorder %s1508_s19, 4   ;;  %s1826_s21 = smov %s1375_s22 }
 0x259   : > { %s1827_s22 = smov %s1379_s23  ;;  %s1828_s23 = smov %s1524_s7 }
 0x25a   : > { %s1829_s24 = smov %s1508_s19  ;;  %26 = sbr.rel (!%p24_p11) target bundleno = 10 (0xa), region = 113 }
 0x25f   :  { %952 = vsyncpa [#allocation3], 1 }
 0x260   :  { %954 = vsyncpa [#allocation3 + $0x1], 1 }
 0x261   :  { %955 = vsyncpa [#allocation6], 1 }
 0x262   :  { %956 = vsyncpa [#allocation4], 1 }
 0x263   :  { %958 = vsyncpa [#allocation4 + $0x1], 1 }
 0x264   :  { %959 = vsyncpa [#allocation10], 1 }
 0x265   :  { %961 = vsyncpa [#allocation10 + $0x1], 1 }

</bundles_post_ra>
